<compile_context>
chip_gen: v7x
topology: tpu7x:2x2x1
jax: 0.10.0
libtpu: 0.0.40
codegen_flags: <defaults>
</compile_context>

<pallas_src>
import jax
import jax.numpy as jnp
from jax import lax
from jax.experimental import pallas as pl
from jax.experimental.pallas import tpu as pltpu

_BN_EPS = 1e-5
_LANE = 128
_VMEM_LIMIT_BYTES = 32 * 1024 * 1024   # safe on v5e/v6e (128 MiB) and v7x (64 MiB)


def _round_up(a, m):
    return (a + m - 1) // m * m


def _pad2d(a, rows, cols):
    return jnp.pad(a, ((0, rows - a.shape[0]), (0, cols - a.shape[1])))


# ----------------------------------------------------------------------------
# In-kernel building blocks (operate on arrays already loaded from refs).
# ----------------------------------------------------------------------------
def _col_sums_mxu(y):
    """Column-wise (sum, sum_sq) of y in one pass, pushed onto the MXU.

    An 8-row all-ones LHS keeps the MXU feed sublane-aligned; all result rows
    are identical so row 0 is taken.  f32 operands keep E[y^2] - E[y]^2
    numerically safe."""
    ones = jnp.ones((8, y.shape[0]), jnp.float32)
    s1 = jnp.dot(ones, y, preferred_element_type=jnp.float32)[0:1]
    s2 = jnp.dot(ones, y * y, preferred_element_type=jnp.float32)[0:1]
    return jnp.concatenate([s1, s2], axis=0)          # (2, C)


def _lin1(x, w1):
    return jnp.dot(x.astype(jnp.bfloat16), w1, preferred_element_type=jnp.float32)


def _bn_relu(y, stats, gamma, beta, inv_n):
    mean = stats[0:1, :] * inv_n
    var = jnp.maximum(stats[1:2, :] * inv_n - mean * mean, 0.0)
    scale = gamma * lax.rsqrt(var + _BN_EPS)           # gamma folded into scale
    return jnp.maximum((y - mean) * scale + beta, 0.0)


def _vfe_linear(pwf, mask, w_top, colsum_bot):
    # cat([pwf, rowmax(pwf).repeat(units)]) @ W == pwf @ W_top + rowmax*colsum(W_bot)
    # pwf >= 0 and padded lanes are 0, so the row-max over padded lanes is exact.
    m = jnp.max(pwf, axis=1, keepdims=True)
    y = jnp.dot(pwf.astype(jnp.bfloat16), w_top, preferred_element_type=jnp.float32)
    return jnp.where(mask, y + m * colsum_bot, 0.0)    # per-row voxel mask


# ----------------------------------------------------------------------------
# Pass 1: layer-1 linear (bias dropped) -> per-tile BN1 (sum, sum_sq) partials.
# ----------------------------------------------------------------------------
def _stats1_kernel(x_ref, w1_ref, part_ref):
    y1 = _lin1(x_ref[...], w1_ref[...])
    part_ref[...] = _col_sums_mxu(y1)[None]


# ----------------------------------------------------------------------------
# Pass 2: recompute lin1, BN1+ReLU, voxel mask, lin2 (rank-1 concat) -> BN2 partials.
# ----------------------------------------------------------------------------
def _make_stats2_kernel(inv_n):
    def kernel(x_ref, w1_ref, s1_ref, g1_ref, be1_ref, w2_ref, cs2_ref, part_ref):
        x = x_ref[...]
        mask = jnp.max(x, axis=1, keepdims=True) != 0.0   # torch.ne(max(x,3)[0],0)
        pwf1 = _bn_relu(_lin1(x, w1_ref[...]), s1_ref[...], g1_ref[...],
                        be1_ref[...], inv_n)
        y2 = _vfe_linear(pwf1, mask, w2_ref[...], cs2_ref[...])
        part_ref[...] = _col_sums_mxu(y2)[None]
    return kernel


# ----------------------------------------------------------------------------
# Pass 3: recompute through lin3 -> BN3 partials.
# ----------------------------------------------------------------------------
def _make_stats3_kernel(inv_n):
    def kernel(x_ref, w1_ref, s1_ref, g1_ref, be1_ref, w2_ref, cs2_ref,
               s2_ref, g2_ref, be2_ref, w3_ref, cs3_ref, part_ref):
        x = x_ref[...]
        mask = jnp.max(x, axis=1, keepdims=True) != 0.0
        pwf1 = _bn_relu(_lin1(x, w1_ref[...]), s1_ref[...], g1_ref[...],
                        be1_ref[...], inv_n)
        y2 = _vfe_linear(pwf1, mask, w2_ref[...], cs2_ref[...])
        pwf2 = _bn_relu(y2, s2_ref[...], g2_ref[...], be2_ref[...], inv_n)
        y3 = _vfe_linear(pwf2, mask, w3_ref[...], cs3_ref[...])
        part_ref[...] = _col_sums_mxu(y3)[None]
    return kernel


# ----------------------------------------------------------------------------
# Pass 4: full recompute, BN3+ReLU, per-tile channel max (AdaptiveMaxPool chain).
# ----------------------------------------------------------------------------
def _make_max_kernel(inv_n, n_valid, tile_rows):
    def kernel(x_ref, w1_ref, s1_ref, g1_ref, be1_ref, w2_ref, cs2_ref,
               s2_ref, g2_ref, be2_ref, w3_ref, cs3_ref,
               s3_ref, g3_ref, be3_ref, out_ref):
        x = x_ref[...]
        mask = jnp.max(x, axis=1, keepdims=True) != 0.0
        pwf1 = _bn_relu(_lin1(x, w1_ref[...]), s1_ref[...], g1_ref[...],
                        be1_ref[...], inv_n)
        y2 = _vfe_linear(pwf1, mask, w2_ref[...], cs2_ref[...])
        pwf2 = _bn_relu(y2, s2_ref[...], g2_ref[...], be2_ref[...], inv_n)
        y3 = _vfe_linear(pwf2, mask, w3_ref[...], cs3_ref[...])
        h = _bn_relu(y3, s3_ref[...], g3_ref[...], be3_ref[...], inv_n)
        # The final FCN output is NOT voxel-masked in the reference; only rows
        # that exist purely because of N-padding must be excluded.  h >= 0
        # (ReLU), so 0 is max-neutral for the real rows.
        row = (pl.program_id(0) * tile_rows
               + lax.broadcasted_iota(jnp.int32, (tile_rows, 1), 0))
        h = jnp.where(row < n_valid, h, 0.0)
        out_ref[...] = jnp.max(h, axis=0, keepdims=True)[None]   # (1, 1, cp3)
    return kernel


# ----------------------------------------------------------------------------
# Wrapper.
# ----------------------------------------------------------------------------
def svfe_forward(x, params, *, n_tile=1024):
    H, W, D, C = x.shape
    n = H * W * D
    xf = x.reshape(n, C).astype(jnp.float32)

    c1 = params["w1"].shape[1]             # cout // 8
    c2 = params["w2"].shape[1]             # cout // 2
    c3 = params["w3"].shape[1]             # cout
    cp1, cp2, cp3 = (_round_up(c, _LANE) for c in (c1, c2, c3))

    # Row tile: as large as comfortably fits the deepest pass's live f32
    # temporaries (x + recomputed activations) in VMEM; multiple of 8 sublanes.
    bytes_per_row = 4 * (C + 3 * (cp1 + cp2 + cp3))
    max_tile = max(256, (_VMEM_LIMIT_BYTES // 3 // bytes_per_row) // 8 * 8)
    tile = min(n_tile, max_tile, _round_up(n, 8))
    n_pad = _round_up(n, tile)
    nt = n_pad // tile
    if n_pad != n:
        # Padded rows are all-zero: mask=0 and (bias dropped) they contribute
        # exactly 0 to every BN sum, so dividing by the true N keeps the batch
        # statistics exact.
        xf = jnp.pad(xf, ((0, n_pad - n), (0, 0)))

    # Weights pre-transposed to (cin, cout); biases dropped (they cancel under
    # training-mode BN mean subtraction).  bf16 for MXU operands; BN params and
    # rank-1 column sums stay f32.  Padded gamma lanes are 0 -> padded channels
    # of every BN output are exactly 0, so stats contamination is impossible.
    w1p = _pad2d(params["w1"], C, cp1).astype(jnp.bfloat16)
    g1p, be1p = _pad2d(params["g1"], 1, cp1), _pad2d(params["be1"], 1, cp1)

    w2 = params["w2"]
    w2a = _pad2d(w2[:c1], cp1, cp2).astype(jnp.bfloat16)
    cs2 = _pad2d(jnp.sum(w2[c1:], axis=0, keepdims=True), 1, cp2)
    g2p, be2p = _pad2d(params["g2"], 1, cp2), _pad2d(params["be2"], 1, cp2)

    w3 = params["w3"]
    w3a = _pad2d(w3[:c2], cp2, cp3).astype(jnp.bfloat16)
    cs3 = _pad2d(jnp.sum(w3[c2:], axis=0, keepdims=True), 1, cp3)
    g3p, be3p = _pad2d(params["g3"], 1, cp3), _pad2d(params["be3"], 1, cp3)

    cparams = pltpu.CompilerParams(dimension_semantics=("parallel",),
                                   vmem_limit_bytes=_VMEM_LIMIT_BYTES)
    inv_n = 1.0 / float(n)

    x_spec = pl.BlockSpec((tile, C), lambda i: (i, 0))      # streamed input

    def resident(arr):
        nd = arr.ndim
        return pl.BlockSpec(arr.shape, lambda i: (0,) * nd)  # DMA'd once, VMEM-resident

    def stats_out(cp):
        return (jax.ShapeDtypeStruct((nt, 2, cp), jnp.float32),
                pl.BlockSpec((1, 2, cp), lambda i: (i, 0, 0)))

    # Pass 1: lin1 -> BN1 partials.
    shape1, spec1 = stats_out(cp1)
    part1 = pl.pallas_call(
        _stats1_kernel, out_shape=shape1, grid=(nt,),
        in_specs=[x_spec, resident(w1p)],
        out_specs=spec1, compiler_params=cparams,
    )(xf, w1p)
    stats1 = jnp.sum(part1, axis=0)                          # (2, cp1) tiny combine

    # Pass 2: recompute lin1, BN1+ReLU, mask, lin2 -> BN2 partials.
    shape2, spec2 = stats_out(cp2)
    args2 = (xf, w1p, stats1, g1p, be1p, w2a, cs2)
    part2 = pl.pallas_call(
        _make_stats2_kernel(inv_n), out_shape=shape2, grid=(nt,),
        in_specs=[x_spec] + [resident(a) for a in args2[1:]],
        out_specs=spec2, compiler_params=cparams,
    )(*args2)
    stats2 = jnp.sum(part2, axis=0)

    # Pass 3: recompute through lin3 -> BN3 partials.
    shape3, spec3 = stats_out(cp3)
    args3 = args2 + (stats2, g2p, be2p, w3a, cs3)
    part3 = pl.pallas_call(
        _make_stats3_kernel(inv_n), out_shape=shape3, grid=(nt,),
        in_specs=[x_spec] + [resident(a) for a in args3[1:]],
        out_specs=spec3, compiler_params=cparams,
    )(*args3)
    stats3 = jnp.sum(part3, axis=0)

    # Pass 4: full forward, BN3+ReLU, per-tile channel max (== AdaptiveMaxPool chain).
    args4 = args3 + (stats3, g3p, be3p)
    partmax = pl.pallas_call(
        _make_max_kernel(inv_n, n, tile),
        out_shape=jax.ShapeDtypeStruct((nt, 1, cp3), jnp.float32),
        grid=(nt,),
        in_specs=[x_spec] + [resident(a) for a in args4[1:]],
        out_specs=pl.BlockSpec((1, 1, cp3), lambda i: (i, 0, 0)),
        compiler_params=cparams,
    )(*args4)

    return jnp.max(partmax, axis=(0, 1))[:c3]                # (cout,)


# ----------------------------------------------------------------------------
# Pure-JAX mirror of the PyTorch forward (with bias, concat, two-pass BN stats)
# for correctness checking.
# ----------------------------------------------------------------------------
def svfe_reference(x, params):
    H, W, D, C = x.shape
    h = x.reshape(-1, C).astype(jnp.float32)
    mask = (jnp.max(h, axis=1, keepdims=True) != 0.0).astype(jnp.float32)

    def fcn(h, i):
        y = h @ params[f"w{i}"] + params[f"b{i}"]
        mean = jnp.mean(y, axis=0, keepdims=True)
        var = jnp.mean((y - mean) ** 2, axis=0, keepdims=True)
        y = (y - mean) * lax.rsqrt(var + _BN_EPS)
        return jnp.maximum(y * params[f"g{i}"] + params[f"be{i}"], 0.0)

    def vfe(h, i):
        pwf = fcn(h, i)
        laf = jnp.broadcast_to(jnp.max(pwf, axis=1, keepdims=True), pwf.shape)
        return jnp.concatenate([pwf, laf], axis=1) * mask

    h = vfe(h, 1)
    h = vfe(h, 2)
    h = fcn(h, 3)
    return jnp.max(h, axis=0)


def init_params(key, cout):
    # SVFE(cout): VFE(94, cout//4) -> FCN(94, cout//8)
    #             VFE(cout//4, cout) -> FCN(cout//4, cout//2)
    #             FCN(cout, cout)
    assert cout % 8 == 0
    layer_dims = [(94, cout // 8), (cout // 4, cout // 2), (cout, cout)]
    params = {}
    for i, (cin, co) in enumerate(layer_dims, start=1):
        k_w, k_b, k_g, k_be, key = jax.random.split(key, 5)
        bound = (1.0 / cin) ** 0.5
        params[f"w{i}"] = jax.random.uniform(
            k_w, (cin, co), jnp.float32, minval=-bound, maxval=bound)  # W.T layout
        params[f"b{i}"] = jax.random.uniform(
            k_b, (1, co), jnp.float32, minval=-bound, maxval=bound)
        params[f"g{i}"] = 1.0 + 0.05 * jax.random.normal(k_g, (1, co), jnp.float32)
        params[f"be{i}"] = 0.05 * jax.random.normal(k_be, (1, co), jnp.float32)
    return params


if __name__ == "__main__":
    H, W, D, CIN, COUT = 2, 4, 8, 94, 32
    key = jax.random.PRNGKey(0)
    kx, kp = jax.random.split(key)

    x = jax.random.normal(kx, (H, W, D, CIN), jnp.float32)
    # Zero out some voxels so the mask (torch.ne(max, 0)) path is exercised.
    vox_idx = jnp.arange(H * W * D).reshape(H, W, D)
    x = x * (vox_idx % 5 != 0).astype(jnp.float32)[..., None]

    params = init_params(kp, COUT)

    out = jax.block_until_ready(svfe_forward(x, params))
    ref = svfe_reference(x, params)

    assert out.shape == (COUT,), out.shape
    # Tolerance covers bf16 MXU operands in the kernel vs the f32 reference.
    if bool(jnp.allclose(out, ref, rtol=3e-2, atol=3e-2)):
        print("KERNEL_OK")
    else:
        print("MISMATCH", float(jnp.max(jnp.abs(out - ref))))
</pallas_src>

<mosaic_0001>
module attributes {stable_mosaic.version = 11 : i64} {
  func.func @_stats1_kernel(%arg0: i32, %arg1: memref<64x94xf32, #tpu.memory_space<vmem>>, %arg2: memref<94x128xbf16, #tpu.memory_space<vmem>>, %arg3: memref<1x2x128xf32, #tpu.memory_space<vmem>>) attributes {dimension_semantics = [#tpu.dimension_semantics<parallel>], iteration_bounds = array<i64: 1>, scalar_prefetch = 0 : i64, scratch_operands = 0 : i64, tpu.core_type = #tpu.core_type<tc>, window_params = [{transform_indices = @transform_0, window_bounds = array<i64: 64, 94>}, {pipeline_mode = #tpu.pipeline_mode<synchronous>, transform_indices = @transform_1, window_bounds = array<i64: 94, 128>}, {transform_indices = @transform_2, window_bounds = array<i64: 1, 2, 128>}]} {
    %c0 = arith.constant 0 : index
    %c0_0 = arith.constant 0 : index
    %0 = vector.load %arg1[%c0, %c0_0] : memref<64x94xf32, #tpu.memory_space<vmem>>, vector<64x94xf32>
    %c0_1 = arith.constant 0 : index
    %c0_2 = arith.constant 0 : index
    %1 = vector.load %arg2[%c0_1, %c0_2] : memref<94x128xbf16, #tpu.memory_space<vmem>>, vector<94x128xbf16>
    %2 = arith.truncf %0 : vector<64x94xf32> to vector<64x94xbf16>
    %cst = arith.constant dense<0.000000e+00> : vector<64x128xf32>
    %3 = tpu.matmul %2, %1, %cst {dimension_numbers = #tpu.dot_dimension_numbers<[1], [0], [0], [1], [0, 0, 1, 1], [], []>} : vector<64x94xbf16>, vector<94x128xbf16>, vector<64x128xf32> -> vector<64x128xf32>
    %cst_3 = arith.constant 1.000000e+00 : f32
    %4 = vector.broadcast %cst_3 : f32 to vector<8x64xf32>
    %cst_4 = arith.constant dense<0.000000e+00> : vector<8x128xf32>
    %5 = tpu.matmul %4, %3, %cst_4 {dimension_numbers = #tpu.dot_dimension_numbers<[1], [0], [0], [1], [0, 0, 1, 1], [], []>} : vector<8x64xf32>, vector<64x128xf32>, vector<8x128xf32> -> vector<8x128xf32>
    %6 = vector.extract_strided_slice %5 {offsets = [0, 0], sizes = [1, 128], strides = [1, 1]} : vector<8x128xf32> to vector<1x128xf32>
    %7 = arith.mulf %3, %3 : vector<64x128xf32>
    %cst_5 = arith.constant dense<0.000000e+00> : vector<8x128xf32>
    %8 = tpu.matmul %4, %7, %cst_5 {dimension_numbers = #tpu.dot_dimension_numbers<[1], [0], [0], [1], [0, 0, 1, 1], [], []>} : vector<8x64xf32>, vector<64x128xf32>, vector<8x128xf32> -> vector<8x128xf32>
    %9 = vector.extract_strided_slice %8 {offsets = [0, 0], sizes = [1, 128], strides = [1, 1]} : vector<8x128xf32> to vector<1x128xf32>
    %10 = tpu.concatenate %6, %9 in 0 : vector<1x128xf32>, vector<1x128xf32> -> vector<2x128xf32>
    %11 = vector.shape_cast %10 : vector<2x128xf32> to vector<1x2x128xf32>
    %c0_6 = arith.constant 0 : index
    %c0_7 = arith.constant 0 : index
    %c0_8 = arith.constant 0 : index
    %12 = vector.load %arg3[%c0_6, %c0_7, %c0_8] : memref<1x2x128xf32, #tpu.memory_space<vmem>>, vector<1x2x128xf32>
    tpu.vector_store %arg3[%c0_6, %c0_7, %c0_8], %11 {strides = array<i32>} : memref<1x2x128xf32, #tpu.memory_space<vmem>>, vector<1x2x128xf32>,
    return
  }
  func.func @transform_0(%arg0: i32) -> (i32, i32) {
    %c0_i32 = arith.constant 0 : i32
    %c0_i32_0 = arith.constant 0 : i32
    return %arg0, %c0_i32 : i32, i32
  }
  func.func @transform_1(%arg0: i32) -> (i32, i32) {
    %c0_i32 = arith.constant 0 : i32
    %c0_i32_0 = arith.constant 0 : i32
    %c0_i32_1 = arith.constant 0 : i32
    return %c0_i32, %c0_i32_0 : i32, i32
  }
  func.func @transform_2(%arg0: i32) -> (i32, i32, i32) {
    %c0_i32 = arith.constant 0 : i32
    %c0_i32_0 = arith.constant 0 : i32
    %c0_i32_1 = arith.constant 0 : i32
    return %arg0, %c0_i32, %c0_i32_0 : i32, i32, i32
  }
}

</mosaic_0001>

<bundles_post_ra>
// kernel: tpu_custom_call.1
= control target key start
LH: loop header
LB: loop body
LE: loop exit
PB: predicated region body
PF: predicated region fallthrough
CT: control target
= control target key end

     0   :  { %7 = vsyncpa [#allocation3], 0  ;;  %s636_s0 = inlined_call_operand.hbm [shape: f32[64,94], index: 0, kind: input, shape index: {}]   ;;  %s637_s1 = inlined_call_operand.hbm [shape: bf16[94,128], index: 1, kind: input, shape index: {}]   ;;  %s638_s2 = inlined_call_operand.hbm [shape: f32[1,2,128], index: 2, kind: output, shape index: {}]  }
   0x1   :  { %8 = vsyncpa [#allocation6], 0 }
   0x2   :  { %9 = vsyncpa [#allocation4], 0  ;;  %s568_s9 = smov [#allocation2]   ;;  %s496_s13 = scalar_lea.hbm %s636_s0, 1024 }
   0x3   :  { %s15_s10 = sshll.u32 %s568_s9, 4  ;;  %p497_p0 = scmp.ne.s32.totalorder %s636_s0, %s496_s13  ;;  %s16_s10 = int_to_ptr.vmem [resolvable:$true] %s15_s10 }
   0x4   :  { %p500_p1 = scmp.lt.u32.totalorder %s496_s13, %s636_s0 }
   0x6   :  { %p502_p2 = pnand %p500_p1, %p497_p0 }
   0x8   :  { %505 = shalt.err (!%p502_p2)
}
   0x9   :  { %s506_s18 = scalar_lea.vmem %s16_s10, 1024  ;;  %p511_p4 = scmp.lt.s32.totalorder %s16_s10, %s16_s10 }
   0xa   :  { %p507_p3 = scmp.ne.s32.totalorder %s16_s10, %s506_s18  ;;  %p512_p5 = scmp.lt.s32.totalorder %s506_s18, %s506_s18 }
   0xc   :  { %p513_p6 = por %p512_p5, %p511_p4 }
   0xe   :  { %p514_p7 = pnand %p513_p6, %p507_p3 }
  0x10   :  { %517 = shalt.err (!%p514_p7)
}
  0x11   :  { %s569_s19 = smov 128   ;;  %s570_s20 = smov 8  }
  0x12   :  { %21 = dma.hbm_to_vmem [thread:$0]  %s636_s0, 1024, %s16_s10, [#allocation3], %s569_s19, %s569_s19, %s570_s20  }
  0x13   :  { %s571_s23 = smov [#allocation5]   ;;  %s518_s27 = scalar_lea.hbm %s637_s1, 768 }
  0x14   :  { %s27_s24 = sshll.u32 %s571_s23, 4  ;;  %p519_p8 = scmp.ne.s32.totalorder %s637_s1, %s518_s27  ;;  %s28_s24 = int_to_ptr.vmem [resolvable:$true] %s27_s24 }
  0x15   :  { %p522_p9 = scmp.lt.u32.totalorder %s518_s27, %s637_s1 }
  0x17   :  { %p524_p10 = pnand %p522_p9, %p519_p8 }
  0x19   :  { %527 = shalt.err (!%p524_p10)
}
  0x1a   :  { %s528_s4 = scalar_lea.vmem %s28_s24, 768  ;;  %p533_p12 = scmp.lt.s32.totalorder %s28_s24, %s28_s24 }
  0x1b   :  { %p529_p11 = scmp.ne.s32.totalorder %s28_s24, %s528_s4  ;;  %p534_p13 = scmp.lt.s32.totalorder %s528_s4, %s528_s4 }
  0x1d   :  { %p535_p0 = por %p534_p13, %p533_p12 }
  0x1f   :  { %p536_p1 = pnand %p535_p0, %p529_p11 }
  0x21   :  { %539 = shalt.err (!%p536_p1)
}
  0x22   :  { %s572_s0 = smov 64   ;;  %s573_s5 = smov 4  }
  0x23   :  { %33 = dma.hbm_to_vmem [thread:$0]  %s637_s1, 768, %s28_s24, [#allocation6], %s572_s0, %s572_s0, %s573_s5  }
  0x24   :  { %562 = dma.done.wait [#allocation3], 1024  }
  0x25   :  { %563 = vsyncadd [#allocation3], 4294966272 }
  0x26   :  { %564 = dma.done.wait [#allocation6], 768  }
  0x27   :  { %565 = vsyncadd [#allocation6], 4294966528  ;;  %v490_v0 = vld [vmem:[#allocation5] sm:$0xff]   ;;  %v491_v1 = vld [vmem:[#allocation5 + $0x8] sm:$0xff]   ;;  %vm100_vm0 = vcmask 769024   ;;  %vm113_vm1 = vcmask 1046528  }
  0x28   :  { %396 = vmatprep.subr.bf16.mxu0 %v490_v0  ;;  %v492_v2 = vld [vmem:[#allocation5 + $0x10] sm:$0xff]   ;;  %v41_v3 = vld [vmem:[#allocation2] sm:$0xff]  ;;  %v42_v4 = vld [vmem:[#allocation2 + $0x8] sm:$0xff]  ;;  %v574_v19 = vmov 0.0|0.0   ;;  %vm575_vm2 = vmmov 0   ;;  %v576_v20 = vmov 0.0  }
  0x29   :  { %397 = vmatpush3.bf16.msra.mxu0 %v490_v0  ;;  %v61_v5 = vpack.c.bf16 %v42_v4, %v41_v3  ;;  %v493_v6 = vld [vmem:[#allocation5 + $0x18] sm:$0xff]   ;;  %v494_v7 = vld [vmem:[#allocation5 + $0x20] sm:$0xff]   ;;  %v495_v8 = vld [vmem:[#allocation5 + $0x28] sm:$0x7f]   ;;  %454 = vmatprep.subr.bf16.mxu1 %v574_v19  ;;  %vm182_vm3 = vcmask 523264   ;;  %v577_v45 = vmov 1.0  }
  0x2a   :  { %398 = vmatprep.subr.bf16.mxu0 %v491_v1  ;;  %v43_v9 = vld [vmem:[#allocation2 + $0x10] sm:$0xff]  ;;  %v44_v10 = vld [vmem:[#allocation2 + $0x18] sm:$0xff]  ;;  %v115_v11 = vsel %vm113_vm1, %v495_v8, 0  ;;  %v45_v12 = vld [vmem:[#allocation2 + $0x20] sm:$0xff]  ;;  %432 = vmatprep.mubr.msk.f32.mxu1 %vm575_vm2, %v576_v20  ;;  %s578_s1 = smov [#allocation7]   ;;  %vm337_vm4 = vcmask 1040384  }
  0x2b   :  { %408 = vmatprep.mubr.msk.bf16.mxu0 %vm100_vm0, %v61_v5  ;;  %v46_v13 = vld [vmem:[#allocation2 + $0x28] sm:$0xff]  ;;  %v62_v14 = vpack.c.bf16 %v44_v10, %v43_v9  ;;  %v47_v16 = vld [vmem:[#allocation2 + $0x30] sm:$0xff]  ;;  %v48_v17 = vld [vmem:[#allocation2 + $0x38] sm:$0xff]  ;;  %s346_s8 = sshll.u32 %s578_s1, 4  ;;  %s347_s8 = int_to_ptr.vmem [resolvable:$true] %s346_s8 }
  0x2c   :  { %v63_v15 = vpack.c.bf16 %v46_v13, %v45_v12  ;;  %v64_v18 = vpack.c.bf16 %v48_v17, %v47_v16  ;;  %s540_s9 = scalar_lea.vmem %s347_s8, 32  ;;  %p545_p3 = scmp.lt.s32.totalorder %s347_s8, %s347_s8 }
  0x2d   :  { %399 = vmatpush3.bf16.msra.mxu0 %v491_v1  ;;  %p541_p2 = scmp.ne.s32.totalorder %s347_s8, %s540_s9  ;;  %p546_p4 = scmp.lt.s32.totalorder %s540_s9, %s540_s9 }
  0x2e   :  { %400 = vmatprep.subr.bf16.mxu0 %v492_v2 }
  0x2f   :  { %p547_p5 = por %p546_p4, %p545_p3 }
  0x31   :  { %401 = vmatpush3.bf16.msra.mxu0 %v492_v2  ;;  %p548_p6 = pnand %p547_p5, %p541_p2 }
  0x32   :  { %402 = vmatprep.subr.bf16.mxu0 %v493_v6 }
  0x35   :  { %403 = vmatpush3.bf16.msra.mxu0 %v493_v6 }
  0x36   :  { %404 = vmatprep.subr.bf16.mxu0 %v494_v7 }
  0x39   :  { %405 = vmatpush3.bf16.msra.mxu0 %v494_v7 }
  0x3a   :  { %478 = vmatprep.subr.msk.bf16.mxu0 %vm113_vm1, %v495_v8 }
  0x3d   :  { %407 = vmatpush3.bf16.msra.mxu0 %v115_v11 }
  0x40   :  { %409 = vmatmul.mubr.msk.bf16.vlgmr.msra.gmra.mrb[0].mxu0 %vm100_vm0, %v62_v14 }
  0x41   :  { %412 = vmatprep.mubr.msk.bf16.mxu0 %vm100_vm0, %v63_v15 }
  0x48   :  { %413 = vmatmul.mubr.msk.bf16.gmra.mrb[4].mxu0 %vm100_vm0, %v64_v18 }
 0x113   :  { %v410_v21 = vpop.f32.mrb[0].mxu0 }
 0x114   :  { %v151_v22 = vpop.f32.mrb[1].mxu0  ;;  %v258_v24 = vmul.f32 %v410_v21, %v410_v21 }
 0x115   :  { %v411_v23 = vpop.f32.mrb[2].mxu0  ;;  %v256_v28 = vmul.f32 %v151_v22, %v151_v22 }
 0x116   :  { %v458_v25 = vpack.c.bf16 %v411_v23, %v410_v21  ;;  %v259_v26 = vmul.f32 %v411_v23, %v411_v23  ;;  %v154_v27 = vpop.f32.mrb[3].mxu0 }
 0x117   :  { %v257_v29 = vmul.f32 %v154_v27, %v154_v27  ;;  %v455_v30 = vpack.c.bf16 %v154_v27, %v151_v22 }
 0x118   :  { %v470_v31 = vpack.c.bf16 %v259_v26, %v258_v24 }
 0x119   :  { %v467_v32 = vpack.c.bf16 %v257_v29, %v256_v28  ;;  %456 = vmatpush3.bf16.msra.mxu1 %v455_v30 }
 0x11a   :  { %457 = vmatprep.subr.bf16.mxu1 %v574_v19 }
 0x11b   :  { %v414_v33 = vpop.f32.mrb[4].mxu0 }
 0x11c   :  { %v167_v34 = vpop.f32.mrb[5].mxu0  ;;  %v262_v36 = vmul.f32 %v414_v33, %v414_v33 }
 0x11d   :  { %v415_v35 = vpop.f32.mrb[6].mxu0  ;;  %459 = vmatpush3.bf16.msra.mxu1 %v458_v25  ;;  %v260_v40 = vmul.f32 %v167_v34, %v167_v34 }
 0x11e   :  { %v464_v37 = vpack.c.bf16 %v415_v35, %v414_v33  ;;  %v263_v38 = vmul.f32 %v415_v35, %v415_v35  ;;  %v170_v39 = vpop.f32.mrb[7].mxu0  ;;  %460 = vmatprep.subr.bf16.mxu1 %v574_v19 }
 0x11f   :  { %v461_v41 = vpack.c.bf16 %v170_v39, %v167_v34  ;;  %v261_v42 = vmul.f32 %v170_v39, %v170_v39 }
 0x120   :  { %v476_v43 = vpack.c.bf16 %v263_v38, %v262_v36 }
 0x121   :  { %v473_v44 = vpack.c.bf16 %v261_v42, %v260_v40  ;;  %462 = vmatpush3.bf16.msra.mxu1 %v461_v41 }
 0x122   :  { %463 = vmatprep.subr.bf16.mxu1 %v574_v19 }
 0x125   :  { %465 = vmatpush3.bf16.msra.mxu1 %v464_v37 }
 0x126   :  { %466 = vmatprep.subr.bf16.mxu1 %v574_v19 }
 0x128   :  { %433 = vmatmul.mubr.msk.f32.vlgmr.msra.gmra.mrb[0].mxu1 %vm182_vm3, %v577_v45 }
 0x129   :  { %468 = vmatpush3.bf16.msra.mxu1 %v467_v32  ;;  %451 = vmatprep.mubr.msk.f32.mxu1 %vm575_vm2, %v576_v20 }
 0x12a   :  { %469 = vmatprep.subr.bf16.mxu1 %v574_v19 }
 0x12d   :  { %471 = vmatpush3.bf16.msra.mxu1 %v470_v31 }
 0x12e   :  { %472 = vmatprep.subr.bf16.mxu1 %v574_v19 }
 0x131   :  { %474 = vmatpush3.bf16.msra.mxu1 %v473_v44 }
 0x132   :  { %475 = vmatprep.subr.bf16.mxu1 %v574_v19 }
 0x135   :  { %477 = vmatpush3.bf16.msra.mxu1 %v476_v43 }
 0x138   :  { %452 = vmatmul.mubr.msk.f32.vlgmr.msra.gmra.mrb[2].mxu1 %vm182_vm3, %v577_v45 }
 0x1fb   :  { %v252_v46 = vpop.f32.mrb[0].mxu1 }
 0x1fc   :  { %v434_v47 = vpop.f32.mrb[1].mxu1 }
 0x20b   :  { %v330_v48 = vpop.f32.mrb[2].mxu1 }
 0x20c   :  { %v335_v49 = vrot.slane %v330_v48, 7  ;;  %v453_v50 = vpop.f32.mrb[3].mxu1 }
 0x20e   :  { %v338_v51 = vsel %vm337_vm4, %v252_v46, %v335_v49 }
 0x20f   :  { %339 = vst [vmem:[#allocation7] sm:$0x3] %v338_v51 }
 0x210   :  { %551 = shalt.err (!%p548_p6)
}
 0x211   :  { %s552_s12 = scalar_lea.hbm %s638_s2, 32 }
 0x212   :  { %p553_p7 = scmp.ne.s32.totalorder %s638_s2, %s552_s12  ;;  %p556_p8 = scmp.lt.u32.totalorder %s552_s12, %s638_s2 }
 0x214   :  { %p558_p9 = pnand %p556_p8, %p553_p7 }
 0x216   :  { %561 = shalt.err (!%p558_p9)
}
 0x217   :  { %349 = dma.vmem_to_hbm [thread:$0]  %s347_s8, 32, %s638_s2, [#allocation4]  }
 0x218   :  { %566 = dma.done.wait [#allocation4], 32  }
 0x219   :  { %567 = vsyncadd [#allocation4], 4294967264 }
 0x21a   :  { %353 = vsyncpa [#allocation3], 1 }
 0x21b   :  { %354 = vsyncpa [#allocation6], 1 }
 0x21c   :  { %355 = vsyncpa [#allocation4], 1 }

</bundles_post_ra>
